<compile_context>
chip_gen: v5e
topology: v5e:2x2
jax: 0.10.0
libtpu: 0.0.40
codegen_flags: <defaults>
</compile_context>

<pallas_src>
import functools

import jax
import jax.numpy as jnp
from jax.experimental import pallas as pl
from jax.experimental.pallas import tpu as pltpu


def _support_kernel(x_ref, w_ref, s_ref):
    # x_ref: (tile_s, F_in), w_ref: (F_in, F_pad) f32, s_ref: (tile_s, F_pad) bf16
    s_ref[...] = jnp.dot(
        x_ref[...], w_ref[...], preferred_element_type=jnp.float32
    ).astype(s_ref.dtype)


def _aggregate_kernel(adj_ref, s_ref, b_ref, o_ref, *, tile_k, resident_support):
    # adj_ref: (tile_n, tile_k) native dtype  adjacency tile (cast to bf16 in-VMEM)
    # s_ref:   (N, F_pad) or (tile_k, F_pad)  bf16 support (resident or streamed)
    # b_ref:   (1, F_pad) f32                 bias
    # o_ref:   (tile_n, F_pad) f32            output row tile, resident across k
    k = pl.program_id(1)

    @pl.when(k == 0)
    def _():
        o_ref[...] = jnp.broadcast_to(b_ref[...], o_ref.shape)

    if resident_support:
        start = pl.multiple_of(k * tile_k, tile_k)
        s = s_ref[pl.ds(start, tile_k), :]
    else:
        s = s_ref[...]

    o_ref[...] += jnp.dot(
        adj_ref[...].astype(jnp.bfloat16), s,
        preferred_element_type=jnp.float32,
    )


def _pick_tile(n, target, granularity, min_tiles=1):
    """Largest t <= target dividing n with t % granularity == 0 (or t == n)."""
    upper = min(target, n)
    for cand in range(upper, 0, -1):
        if n % cand:
            continue
        if n // cand < min_tiles:
            continue
        if cand % granularity != 0 and cand != n:
            continue
        return cand
    return n


def _vmem_limit_bytes():
    cap = 64 * 1024 * 1024  # safe fallback (v7x per-TC size)
    try:
        cap = int(pltpu.get_tpu_info().vmem_capacity_bytes)
    except Exception:
        pass
    # Leave ~8 MiB of headroom; never exceed ~100 MiB even on 128 MiB parts.
    return max(32 * 1024 * 1024, min(cap - 8 * 1024 * 1024, 100 * 1024 * 1024))


def graph_conv(x, adj, w, bias=None, *, tile_n=512, tile_k=512):
    N, f_in = x.shape
    f_out = w.shape[1]
    assert adj.shape == (N, N)

    # Pad the output-feature axis to a lane-dense multiple of 128. Padded
    # columns of w / bias are zero, so padded output columns are exactly zero.
    f_pad = ((f_out + 127) // 128) * 128
    w_p = jnp.pad(w, ((0, 0), (0, f_pad - f_out)))
    if bias is None:
        b_p = jnp.zeros((1, f_pad), jnp.float32)
    else:
        b_p = jnp.pad(bias.reshape(1, f_out).astype(jnp.float32),
                      ((0, 0), (0, f_pad - f_out)))

    # Row tile: keep >=2 tiles so v7x's two TensorCores both get work on the
    # "parallel" axis. K tile must be a multiple of 128 (adj lane dim).
    tile_n = _pick_tile(N, tile_n, 8, min_tiles=2 if N >= 16 else 1)
    tile_k = _pick_tile(N, tile_k, 128, min_tiles=1)

    vmem_limit = _vmem_limit_bytes()

    # --- support = x @ w, computed exactly once, with its own large row tile --
    tile_s = _pick_tile(N, 1024, 8, min_tiles=1)
    support = pl.pallas_call(
        _support_kernel,
        out_shape=jax.ShapeDtypeStruct((N, f_pad), jnp.bfloat16),
        grid_spec=pltpu.PrefetchScalarGridSpec(
            num_scalar_prefetch=0,
            grid=(N // tile_s,),
            in_specs=[
                pl.BlockSpec((tile_s, f_in), lambda i: (i, 0)),   # x row tile
                pl.BlockSpec((f_in, f_pad), lambda i: (0, 0)),    # w (full)
            ],
            out_specs=pl.BlockSpec((tile_s, f_pad), lambda i: (i, 0)),
        ),
        compiler_params=pltpu.CompilerParams(
            dimension_semantics=("parallel",),
            vmem_limit_bytes=vmem_limit,
        ),
    )(x, w_p)

    # --- output = adj @ support + bias, K-tiled, accumulate into o_ref --------
    # Keep the resident support comfortably inside VMEM on every generation
    # (v7x has only 64 MiB/TC); otherwise stream k-slabs from HBM.
    support_bytes = N * f_pad * 2
    resident = support_bytes <= min(16 * 1024 * 1024, vmem_limit // 3)

    if resident:
        s_spec = pl.BlockSpec((N, f_pad), lambda i, k: (0, 0))     # DMA'd once
    else:
        s_spec = pl.BlockSpec((tile_k, f_pad), lambda i, k: (k, 0))

    out = pl.pallas_call(
        functools.partial(_aggregate_kernel, tile_k=tile_k,
                          resident_support=resident),
        out_shape=jax.ShapeDtypeStruct((N, f_pad), jnp.float32),
        grid_spec=pltpu.PrefetchScalarGridSpec(
            num_scalar_prefetch=0,
            grid=(N // tile_n, N // tile_k),
            in_specs=[
                pl.BlockSpec((tile_n, tile_k), lambda i, k: (i, k)),  # adj tile
                s_spec,                                               # support
                pl.BlockSpec((1, f_pad), lambda i, k: (0, 0)),        # bias
            ],
            out_specs=pl.BlockSpec((tile_n, f_pad), lambda i, k: (i, 0)),
        ),
        compiler_params=pltpu.CompilerParams(
            dimension_semantics=("parallel", "arbitrary"),
            vmem_limit_bytes=vmem_limit,
        ),
    )(adj, support, b_p)

    return out if f_pad == f_out else out[:, :f_out]


if __name__ == "__main__":
    # Small-but-representative problem: N nodes, in_features -> out_features.
    N, in_features, out_features = 512, 64, 64

    key = jax.random.PRNGKey(0)
    k_x, k_adj, k_w, k_b = jax.random.split(key, 4)

    # Parameter init mirroring the torch module:
    # uniform(-stdv, stdv) with stdv = 1/sqrt(out_features).
    stdv = 1.0 / (out_features ** 0.5)
    w = jax.random.uniform(k_w, (in_features, out_features),
                           minval=-stdv, maxval=stdv, dtype=jnp.float32)
    bias = jax.random.uniform(k_b, (out_features,),
                              minval=-stdv, maxval=stdv, dtype=jnp.float32)

    # Inputs: node features and a dense, row-normalized adjacency matrix.
    x = jax.random.normal(k_x, (N, in_features), dtype=jnp.float32)
    adj_raw = (jax.random.uniform(k_adj, (N, N)) < 0.1).astype(jnp.float32)
    adj = adj_raw + jnp.eye(N, dtype=jnp.float32)        # add self-loops
    adj = adj / jnp.sum(adj, axis=1, keepdims=True)      # row-normalize
    # TODO(synk): the torch module accepts a torch.sparse adjacency; here it is
    # handled as a dense matmul (no clean sparse-matmul Pallas primitive).

    out = graph_conv(x, adj, w, bias)
    out = jax.block_until_ready(out)

    # Reference in plain f32 JAX. The kernel feeds adj/support to the MXU as
    # bf16 with f32 accumulation, so allow bf16-level tolerance.
    ref = adj @ (x @ w) + bias[None, :]
    assert out.shape == (N, out_features)
    assert jnp.allclose(out, ref, atol=2e-2, rtol=2e-2), "mismatch vs reference"

    print("KERNEL_OK")
</pallas_src>

<mosaic_0001>
module attributes {stable_mosaic.version = 11 : i64} {
  func.func @_support_kernel(%arg0: i32, %arg1: memref<512x64xf32, #tpu.memory_space<vmem>>, %arg2: memref<64x128xf32, #tpu.memory_space<vmem>>, %arg3: memref<512x128xbf16, #tpu.memory_space<vmem>>) attributes {dimension_semantics = [#tpu.dimension_semantics<parallel>], iteration_bounds = array<i64: 1>, scalar_prefetch = 0 : i64, scratch_operands = 0 : i64, tpu.core_type = #tpu.core_type<tc>, window_params = [{transform_indices = @transform_0, window_bounds = array<i64: 512, 64>}, {pipeline_mode = #tpu.pipeline_mode<synchronous>, transform_indices = @transform_1, window_bounds = array<i64: 64, 128>}, {transform_indices = @transform_2, window_bounds = array<i64: 512, 128>}]} {
    %c0 = arith.constant 0 : index
    %c0_0 = arith.constant 0 : index
    %0 = vector.load %arg1[%c0, %c0_0] : memref<512x64xf32, #tpu.memory_space<vmem>>, vector<512x64xf32>
    %c0_1 = arith.constant 0 : index
    %c0_2 = arith.constant 0 : index
    %1 = vector.load %arg2[%c0_1, %c0_2] : memref<64x128xf32, #tpu.memory_space<vmem>>, vector<64x128xf32>
    %cst = arith.constant dense<0.000000e+00> : vector<512x128xf32>
    %2 = tpu.matmul %0, %1, %cst {dimension_numbers = #tpu.dot_dimension_numbers<[1], [0], [0], [1], [0, 0, 1, 1], [], []>} : vector<512x64xf32>, vector<64x128xf32>, vector<512x128xf32> -> vector<512x128xf32>
    %3 = arith.truncf %2 : vector<512x128xf32> to vector<512x128xbf16>
    %c0_3 = arith.constant 0 : index
    %c0_4 = arith.constant 0 : index
    %4 = vector.load %arg3[%c0_3, %c0_4] : memref<512x128xbf16, #tpu.memory_space<vmem>>, vector<512x128xbf16>
    tpu.vector_store %arg3[%c0_3, %c0_4], %3 {strides = array<i32>} : memref<512x128xbf16, #tpu.memory_space<vmem>>, vector<512x128xbf16>,
    return
  }
  func.func @transform_0(%arg0: i32) -> (i32, i32) {
    %c0_i32 = arith.constant 0 : i32
    %c0_i32_0 = arith.constant 0 : i32
    return %arg0, %c0_i32 : i32, i32
  }
  func.func @transform_1(%arg0: i32) -> (i32, i32) {
    %c0_i32 = arith.constant 0 : i32
    %c0_i32_0 = arith.constant 0 : i32
    %c0_i32_1 = arith.constant 0 : i32
    return %c0_i32, %c0_i32_0 : i32, i32
  }
  func.func @transform_2(%arg0: i32) -> (i32, i32) {
    %c0_i32 = arith.constant 0 : i32
    %c0_i32_0 = arith.constant 0 : i32
    return %arg0, %c0_i32 : i32, i32
  }
}

</mosaic_0001>

<bundles_post_ra>
// kernel: tpu_custom_call.1
= control target key start
LH: loop header
LB: loop body
LE: loop exit
PB: predicated region body
PF: predicated region fallthrough
CT: control target
= control target key end

     0   :  { %s1241_s0 = inlined_call_operand.vmem [shape: f32[512,64], index: 0, kind: input, shape index: {}]   ;;  %s1242_s1 = inlined_call_operand.vmem [shape: f32[64,128], index: 1, kind: input, shape index: {}]   ;;  %s1243_s2 = inlined_call_operand.hbm [shape: bf16[512,128], index: 2, kind: output, shape index: {}]  }
   0x1   :  { %v83_v0 = vld [vmem:[%s1242_s1 + $0x38] sm:$0xff]  ;;  %v82_v1 = vld [vmem:[%s1242_s1 + $0x30] sm:$0xff]  ;;  %v81_v2 = vld [vmem:[%s1242_s1 + $0x28] sm:$0xff] }
   0x2   :  { %285 = vmatpush.msra.mxu0 %v83_v0  ;;  %887 = vmatpush.msra.mxu1 %v83_v0  ;;  %v80_v3 = vld [vmem:[%s1242_s1 + $0x20] sm:$0xff]  ;;  %v79_v4 = vld [vmem:[%s1242_s1 + $0x18] sm:$0xff] }
   0x3   :  { %888 = vmatpush.msra.mxu2 %v83_v0  ;;  %889 = vmatpush.msra.mxu3 %v83_v0 }
   0x4   :  { %286 = vmatpush.msra.mxu0 %v82_v1  ;;  %890 = vmatpush.msra.mxu1 %v82_v1 }
   0x5   :  { %891 = vmatpush.msra.mxu2 %v82_v1  ;;  %892 = vmatpush.msra.mxu3 %v82_v1 }
   0x6   :  { %287 = vmatpush.msra.mxu0 %v81_v2  ;;  %893 = vmatpush.msra.mxu1 %v81_v2 }
   0x7   :  { %894 = vmatpush.msra.mxu2 %v81_v2  ;;  %895 = vmatpush.msra.mxu3 %v81_v2 }
   0x8   :  { %288 = vmatpush.msra.mxu0 %v80_v3  ;;  %896 = vmatpush.msra.mxu1 %v80_v3 }
   0x9   :  { %7 = vsyncpa [#allocation3], 0  ;;  %897 = vmatpush.msra.mxu2 %v80_v3  ;;  %898 = vmatpush.msra.mxu3 %v80_v3  ;;  %v78_v5 = vld [vmem:[%s1242_s1 + $0x10] sm:$0xff]  ;;  %v77_v6 = vld [vmem:[%s1242_s1 + $0x8] sm:$0xff]  ;;  %vm84_vm0 = vcmask 523264   ;;  %s620_s11 = sshll.u32 %s1243_s2, 4  ;;  %s621_s11 = int_to_ptr.hbm [resolvable:$true] %s620_s11 }
   0xa   :  { %289 = vmatpush.msra.mxu0 %v79_v4  ;;  %899 = vmatpush.msra.mxu1 %v79_v4  ;;  %v76_v7 = vld [vmem:[%s1242_s1] sm:$0xff]  ;;  %v13_v12 = vld [vmem:[%s1241_s0 + $0x8] sm:$0xff]  ;;  %v14_v16 = vld [vmem:[%s1241_s0 + $0x10] sm:$0xff]  ;;  %s941_s12 = smov 64   ;;  %s942_s13 = smov 4  }
   0xb   :  { %900 = vmatpush.msra.mxu2 %v79_v4  ;;  %901 = vmatpush.msra.mxu3 %v79_v4  ;;  %v12_v8 = vld [vmem:[%s1241_s0] sm:$0xff]  ;;  %v29_v13 = vld [vmem:[%s1241_s0 + $0x88] sm:$0xff]  ;;  %v30_v17 = vld [vmem:[%s1241_s0 + $0x90] sm:$0xff] }
   0xc   :  { %290 = vmatpush.msra.mxu0 %v78_v5  ;;  %902 = vmatpush.msra.mxu1 %v78_v5  ;;  %v28_v9 = vld [vmem:[%s1241_s0 + $0x80] sm:$0xff]  ;;  %v45_v14 = vld [vmem:[%s1241_s0 + $0x108] sm:$0xff]  ;;  %v46_v18 = vld [vmem:[%s1241_s0 + $0x110] sm:$0xff] }
   0xd   :  { %903 = vmatpush.msra.mxu2 %v78_v5  ;;  %904 = vmatpush.msra.mxu3 %v78_v5  ;;  %v44_v10 = vld [vmem:[%s1241_s0 + $0x100] sm:$0xff]  ;;  %v61_v15 = vld [vmem:[%s1241_s0 + $0x188] sm:$0xff]  ;;  %v62_v19 = vld [vmem:[%s1241_s0 + $0x190] sm:$0xff] }
   0xe   :  { %291 = vmatpush.msra.mxu0 %v77_v6  ;;  %905 = vmatpush.msra.mxu1 %v77_v6  ;;  %v60_v11 = vld [vmem:[%s1241_s0 + $0x180] sm:$0xff]  ;;  %v15_v20 = vld [vmem:[%s1241_s0 + $0x18] sm:$0xff]  ;;  %v17_v28 = vld [vmem:[%s1241_s0 + $0x28] sm:$0xff] }
   0xf   :  { %906 = vmatpush.msra.mxu2 %v77_v6  ;;  %907 = vmatpush.msra.mxu3 %v77_v6  ;;  %v31_v21 = vld [vmem:[%s1241_s0 + $0x98] sm:$0xff]  ;;  %v16_v24 = vld [vmem:[%s1241_s0 + $0x20] sm:$0xff]  ;;  %v33_v29 = vld [vmem:[%s1241_s0 + $0xa8] sm:$0xff] }
  0x10   :  { %292 = vmatpush.msra.mxu0 %v76_v7  ;;  %908 = vmatpush.msra.mxu1 %v76_v7  ;;  %v47_v22 = vld [vmem:[%s1241_s0 + $0x118] sm:$0xff]  ;;  %v32_v25 = vld [vmem:[%s1241_s0 + $0xa0] sm:$0xff]  ;;  %v49_v30 = vld [vmem:[%s1241_s0 + $0x128] sm:$0xff] }
  0x11   :  { %909 = vmatpush.msra.mxu2 %v76_v7  ;;  %910 = vmatpush.msra.mxu3 %v76_v7  ;;  %v63_v23 = vld [vmem:[%s1241_s0 + $0x198] sm:$0xff]  ;;  %v48_v26 = vld [vmem:[%s1241_s0 + $0x120] sm:$0xff]  ;;  %v65_v31 = vld [vmem:[%s1241_s0 + $0x1a8] sm:$0xff] }
  0x12   :  { %632 = vmatmul.msk.f32.vlgmr.msra.gmra.mxu0 %vm84_vm0, %v12_v8  ;;  %648 = vmatmul.msk.f32.vlgmr.msra.gmra.mxu1 %vm84_vm0, %v28_v9  ;;  %v64_v27 = vld [vmem:[%s1241_s0 + $0x1a0] sm:$0xff]  ;;  %v18_v32 = vld [vmem:[%s1241_s0 + $0x30] sm:$0xff]  ;;  %v19_v36 = vld [vmem:[%s1241_s0 + $0x38] sm:$0xff] }
  0x13   :  { %664 = vmatmul.msk.f32.vlgmr.msra.gmra.mxu2 %vm84_vm0, %v44_v10  ;;  %680 = vmatmul.msk.f32.vlgmr.msra.gmra.mxu3 %vm84_vm0, %v60_v11  ;;  %v34_v33 = vld [vmem:[%s1241_s0 + $0xb0] sm:$0xff]  ;;  %v35_v37 = vld [vmem:[%s1241_s0 + $0xb8] sm:$0xff]  ;;  %v20_v40 = vld [vmem:[%s1241_s0 + $0x40] sm:$0xff] }
  0x14   :  { %v50_v34 = vld [vmem:[%s1241_s0 + $0x130] sm:$0xff]  ;;  %v51_v38 = vld [vmem:[%s1241_s0 + $0x138] sm:$0xff]  ;;  %v36_v41 = vld [vmem:[%s1241_s0 + $0xc0] sm:$0xff] }
  0x15   :  { %v66_v35 = vld [vmem:[%s1241_s0 + $0x1b0] sm:$0xff]  ;;  %v67_v39 = vld [vmem:[%s1241_s0 + $0x1b8] sm:$0xff]  ;;  %v52_v42 = vld [vmem:[%s1241_s0 + $0x140] sm:$0xff] }
  0x16   :  { %v68_v43 = vld [vmem:[%s1241_s0 + $0x1c0] sm:$0xff]  ;;  %v21_v44 = vld [vmem:[%s1241_s0 + $0x48] sm:$0xff]  ;;  %v22_v48 = vld [vmem:[%s1241_s0 + $0x50] sm:$0xff] }
  0x17   :  { %v37_v45 = vld [vmem:[%s1241_s0 + $0xc8] sm:$0xff]  ;;  %v38_v49 = vld [vmem:[%s1241_s0 + $0xd0] sm:$0xff]  ;;  %v23_v52 = vld [vmem:[%s1241_s0 + $0x58] sm:$0xff] }
  0x18   :  { %v53_v46 = vld [vmem:[%s1241_s0 + $0x148] sm:$0xff]  ;;  %v54_v50 = vld [vmem:[%s1241_s0 + $0x150] sm:$0xff]  ;;  %v39_v53 = vld [vmem:[%s1241_s0 + $0xd8] sm:$0xff] }
  0x19   :  { %v69_v47 = vld [vmem:[%s1241_s0 + $0x1c8] sm:$0xff]  ;;  %v70_v51 = vld [vmem:[%s1241_s0 + $0x1d0] sm:$0xff]  ;;  %v55_v54 = vld [vmem:[%s1241_s0 + $0x158] sm:$0xff] }
  0x1a   :  { %633 = vmatmul.msk.f32.gmra.mxu0 %vm84_vm0, %v13_v12  ;;  %649 = vmatmul.msk.f32.gmra.mxu1 %vm84_vm0, %v29_v13  ;;  %v71_v55 = vld [vmem:[%s1241_s0 + $0x1d8] sm:$0xff]  ;;  %v24_v56 = vld [vmem:[%s1241_s0 + $0x60] sm:$0xff]  ;;  %v25_v60 = vld [vmem:[%s1241_s0 + $0x68] sm:$0xff] }
  0x1b   :  { %665 = vmatmul.msk.f32.gmra.mxu2 %vm84_vm0, %v45_v14  ;;  %681 = vmatmul.msk.f32.gmra.mxu3 %vm84_vm0, %v61_v15  ;;  %v40_v57 = vld [vmem:[%s1241_s0 + $0xe0] sm:$0xff]  ;;  %v41_v61 = vld [vmem:[%s1241_s0 + $0xe8] sm:$0xff]  ;;  %v26_v0 = vld [vmem:[%s1241_s0 + $0x70] sm:$0xff] }
  0x1c   :  { %v56_v58 = vld [vmem:[%s1241_s0 + $0x160] sm:$0xff]  ;;  %v57_v62 = vld [vmem:[%s1241_s0 + $0x168] sm:$0xff]  ;;  %v42_v1 = vld [vmem:[%s1241_s0 + $0xf0] sm:$0xff] }
  0x1d   :  { %v72_v59 = vld [vmem:[%s1241_s0 + $0x1e0] sm:$0xff]  ;;  %v73_v63 = vld [vmem:[%s1241_s0 + $0x1e8] sm:$0xff]  ;;  %v58_v2 = vld [vmem:[%s1241_s0 + $0x170] sm:$0xff] }
  0x1e   :  { %v74_v3 = vld [vmem:[%s1241_s0 + $0x1f0] sm:$0xff]  ;;  %v27_v4 = vld [vmem:[%s1241_s0 + $0x78] sm:$0xff] }
  0x1f   :  { %v43_v5 = vld [vmem:[%s1241_s0 + $0xf8] sm:$0xff] }
  0x20   :  { %v59_v6 = vld [vmem:[%s1241_s0 + $0x178] sm:$0xff] }
  0x21   :  { %v75_v7 = vld [vmem:[%s1241_s0 + $0x1f8] sm:$0xff]  ;;  %s940_s0 = smov [#allocation2]  }
  0x22   :  { %634 = vmatmul.msk.f32.gmra.mxu0 %vm84_vm0, %v14_v16  ;;  %650 = vmatmul.msk.f32.gmra.mxu1 %vm84_vm0, %v30_v17  ;;  %s618_s8 = sshll.u32 %s940_s0, 4  ;;  %s619_s8 = int_to_ptr.vmem [resolvable:$true] %s618_s8 }
  0x23   :  { %666 = vmatmul.msk.f32.gmra.mxu2 %vm84_vm0, %v46_v18  ;;  %682 = vmatmul.msk.f32.gmra.mxu3 %vm84_vm0, %v62_v19 }
  0x2a   :  { %635 = vmatmul.msk.f32.gmra.mxu0 %vm84_vm0, %v15_v20  ;;  %651 = vmatmul.msk.f32.gmra.mxu1 %vm84_vm0, %v31_v21 }
  0x2b   :  { %667 = vmatmul.msk.f32.gmra.mxu2 %vm84_vm0, %v47_v22  ;;  %683 = vmatmul.msk.f32.gmra.mxu3 %vm84_vm0, %v63_v23 }
  0x32   :  { %636 = vmatmul.msk.f32.gmra.mxu0 %vm84_vm0, %v16_v24  ;;  %652 = vmatmul.msk.f32.gmra.mxu1 %vm84_vm0, %v32_v25 }
  0x33   :  { %668 = vmatmul.msk.f32.gmra.mxu2 %vm84_vm0, %v48_v26  ;;  %684 = vmatmul.msk.f32.gmra.mxu3 %vm84_vm0, %v64_v27 }
  0x3a   :  { %637 = vmatmul.msk.f32.gmra.mxu0 %vm84_vm0, %v17_v28  ;;  %653 = vmatmul.msk.f32.gmra.mxu1 %vm84_vm0, %v33_v29 }
  0x3b   :  { %669 = vmatmul.msk.f32.gmra.mxu2 %vm84_vm0, %v49_v30  ;;  %685 = vmatmul.msk.f32.gmra.mxu3 %vm84_vm0, %v65_v31 }
  0x42   :  { %638 = vmatmul.msk.f32.gmra.mxu0 %vm84_vm0, %v18_v32  ;;  %654 = vmatmul.msk.f32.gmra.mxu1 %vm84_vm0, %v34_v33 }
  0x43   :  { %670 = vmatmul.msk.f32.gmra.mxu2 %vm84_vm0, %v50_v34  ;;  %686 = vmatmul.msk.f32.gmra.mxu3 %vm84_vm0, %v66_v35 }
  0x4a   :  { %639 = vmatmul.msk.f32.gmra.mxu0 %vm84_vm0, %v19_v36  ;;  %655 = vmatmul.msk.f32.gmra.mxu1 %vm84_vm0, %v35_v37 }
  0x4b   :  { %671 = vmatmul.msk.f32.gmra.mxu2 %vm84_vm0, %v51_v38  ;;  %687 = vmatmul.msk.f32.gmra.mxu3 %vm84_vm0, %v67_v39 }
  0x52   :  { %640 = vmatmul.msk.f32.gmra.mxu0 %vm84_vm0, %v20_v40  ;;  %656 = vmatmul.msk.f32.gmra.mxu1 %vm84_vm0, %v36_v41 }
  0x53   :  { %672 = vmatmul.msk.f32.gmra.mxu2 %vm84_vm0, %v52_v42  ;;  %688 = vmatmul.msk.f32.gmra.mxu3 %vm84_vm0, %v68_v43 }
  0x5a   :  { %641 = vmatmul.msk.f32.gmra.mxu0 %vm84_vm0, %v21_v44  ;;  %657 = vmatmul.msk.f32.gmra.mxu1 %vm84_vm0, %v37_v45 }
  0x5b   :  { %673 = vmatmul.msk.f32.gmra.mxu2 %vm84_vm0, %v53_v46  ;;  %689 = vmatmul.msk.f32.gmra.mxu3 %vm84_vm0, %v69_v47 }
  0x62   :  { %642 = vmatmul.msk.f32.gmra.mxu0 %vm84_vm0, %v22_v48  ;;  %658 = vmatmul.msk.f32.gmra.mxu1 %vm84_vm0, %v38_v49 }
  0x63   :  { %674 = vmatmul.msk.f32.gmra.mxu2 %vm84_vm0, %v54_v50  ;;  %690 = vmatmul.msk.f32.gmra.mxu3 %vm84_vm0, %v70_v51 }
  0x6a   :  { %643 = vmatmul.msk.f32.gmra.mxu0 %vm84_vm0, %v23_v52  ;;  %659 = vmatmul.msk.f32.gmra.mxu1 %vm84_vm0, %v39_v53 }
  0x6b   :  { %675 = vmatmul.msk.f32.gmra.mxu2 %vm84_vm0, %v55_v54  ;;  %691 = vmatmul.msk.f32.gmra.mxu3 %vm84_vm0, %v71_v55 }
  0x72   :  { %644 = vmatmul.msk.f32.gmra.mxu0 %vm84_vm0, %v24_v56  ;;  %660 = vmatmul.msk.f32.gmra.mxu1 %vm84_vm0, %v40_v57 }
  0x73   :  { %676 = vmatmul.msk.f32.gmra.mxu2 %vm84_vm0, %v56_v58  ;;  %692 = vmatmul.msk.f32.gmra.mxu3 %vm84_vm0, %v72_v59 }
  0x7a   :  { %645 = vmatmul.msk.f32.gmra.mxu0 %vm84_vm0, %v25_v60  ;;  %661 = vmatmul.msk.f32.gmra.mxu1 %vm84_vm0, %v41_v61 }
  0x7b   :  { %677 = vmatmul.msk.f32.gmra.mxu2 %vm84_vm0, %v57_v62  ;;  %693 = vmatmul.msk.f32.gmra.mxu3 %vm84_vm0, %v73_v63 }
  0x82   :  { %646 = vmatmul.msk.f32.gmra.mxu0 %vm84_vm0, %v26_v0  ;;  %662 = vmatmul.msk.f32.gmra.mxu1 %vm84_vm0, %v42_v1 }
  0x83   :  { %678 = vmatmul.msk.f32.gmra.mxu2 %vm84_vm0, %v58_v2  ;;  %694 = vmatmul.msk.f32.gmra.mxu3 %vm84_vm0, %v74_v3 }
  0x8a   :  { %647 = vmatmul.msk.f32.gmra.mxu0 %vm84_vm0, %v27_v4  ;;  %663 = vmatmul.msk.f32.gmra.mxu1 %vm84_vm0, %v43_v5 }
  0x8b   :  { %679 = vmatmul.msk.f32.gmra.mxu2 %vm84_vm0, %v59_v6  ;;  %695 = vmatmul.msk.f32.gmra.mxu3 %vm84_vm0, %v75_v7 }
  0x8f   :  { %v294_v8 = vpop.f32.mrf.mxu0  ;;  %v342_v9 = vpop.f32.mrf.mxu1 }
  0x96   :  { %v390_v10 = vpop.f32.mrf.mxu2  ;;  %v438_v11 = vpop.f32.mrf.mxu3 }
  0x97   :  { %v297_v12 = vpop.f32.mrf.mxu0  ;;  %v345_v13 = vpop.f32.mrf.mxu1 }
  0x98   :  { %v699_v14 = vpack.c.bf16 %v297_v12, %v294_v8  ;;  %v739_v15 = vpack.c.bf16 %v345_v13, %v342_v9 }
  0x9a   :  { %700 = vst [vmem:[#allocation2] sm:$0xff] %v699_v14  }
  0x9b   :  { %863 = vst [vmem:[#allocation2 + $0x40] sm:$0xff] %v739_v15  }
  0x9e   :  { %v393_v16 = vpop.f32.mrf.mxu2  ;;  %v441_v17 = vpop.f32.mrf.mxu3 }
  0x9f   :  { %v779_v18 = vpack.c.bf16 %v393_v16, %v390_v10  ;;  %v819_v19 = vpack.c.bf16 %v441_v17, %v438_v11  ;;  %v300_v20 = vpop.f32.mrf.mxu0  ;;  %v348_v21 = vpop.f32.mrf.mxu1 }
  0xa1   :  { %871 = vst [vmem:[#allocation2 + $0x80] sm:$0xff] %v779_v18  }
  0xa2   :  { %879 = vst [vmem:[#allocation2 + $0xc0] sm:$0xff] %v819_v19  }
  0xa6   :  { %v396_v22 = vpop.f32.mrf.mxu2  ;;  %v444_v23 = vpop.f32.mrf.mxu3 }
  0xa7   :  { %v303_v24 = vpop.f32.mrf.mxu0  ;;  %v351_v25 = vpop.f32.mrf.mxu1 }
  0xa8   :  { %v704_v26 = vpack.c.bf16 %v303_v24, %v300_v20  ;;  %v744_v27 = vpack.c.bf16 %v351_v25, %v348_v21 }
  0xaa   :  { %856 = vst [vmem:[#allocation2 + $0x8] sm:$0xff] %v704_v26  }
  0xab   :  { %864 = vst [vmem:[#allocation2 + $0x48] sm:$0xff] %v744_v27  }
  0xae   :  { %v399_v28 = vpop.f32.mrf.mxu2  ;;  %v447_v29 = vpop.f32.mrf.mxu3 }
  0xaf   :  { %v784_v30 = vpack.c.bf16 %v399_v28, %v396_v22  ;;  %v824_v31 = vpack.c.bf16 %v447_v29, %v444_v23  ;;  %v306_v32 = vpop.f32.mrf.mxu0  ;;  %v354_v33 = vpop.f32.mrf.mxu1 }
  0xb1   :  { %872 = vst [vmem:[#allocation2 + $0x88] sm:$0xff] %v784_v30  }
  0xb2   :  { %880 = vst [vmem:[#allocation2 + $0xc8] sm:$0xff] %v824_v31  }
  0xb6   :  { %v402_v34 = vpop.f32.mrf.mxu2  ;;  %v450_v35 = vpop.f32.mrf.mxu3 }
  0xb7   :  { %v309_v36 = vpop.f32.mrf.mxu0  ;;  %v357_v37 = vpop.f32.mrf.mxu1 }
  0xb8   :  { %v709_v38 = vpack.c.bf16 %v309_v36, %v306_v32  ;;  %v749_v39 = vpack.c.bf16 %v357_v37, %v354_v33 }
  0xba   :  { %857 = vst [vmem:[#allocation2 + $0x10] sm:$0xff] %v709_v38  }
  0xbb   :  { %865 = vst [vmem:[#allocation2 + $0x50] sm:$0xff] %v749_v39  }
  0xbe   :  { %v405_v40 = vpop.f32.mrf.mxu2  ;;  %v453_v41 = vpop.f32.mrf.mxu3 }
  0xbf   :  { %v789_v42 = vpack.c.bf16 %v405_v40, %v402_v34  ;;  %v829_v43 = vpack.c.bf16 %v453_v41, %v450_v35  ;;  %v312_v44 = vpop.f32.mrf.mxu0  ;;  %v360_v45 = vpop.f32.mrf.mxu1 }
  0xc1   :  { %873 = vst [vmem:[#allocation2 + $0x90] sm:$0xff] %v789_v42  }
  0xc2   :  { %881 = vst [vmem:[#allocation2 + $0xd0] sm:$0xff] %v829_v43  }
  0xc6   :  { %v408_v46 = vpop.f32.mrf.mxu2  ;;  %v456_v47 = vpop.f32.mrf.mxu3 }
  0xc7   :  { %v315_v48 = vpop.f32.mrf.mxu0  ;;  %v363_v49 = vpop.f32.mrf.mxu1 }
  0xc8   :  { %v714_v50 = vpack.c.bf16 %v315_v48, %v312_v44  ;;  %v754_v51 = vpack.c.bf16 %v363_v49, %v360_v45 }
  0xca   :  { %858 = vst [vmem:[#allocation2 + $0x18] sm:$0xff] %v714_v50  }
  0xcb   :  { %866 = vst [vmem:[#allocation2 + $0x58] sm:$0xff] %v754_v51  }
  0xce   :  { %v411_v52 = vpop.f32.mrf.mxu2  ;;  %v459_v53 = vpop.f32.mrf.mxu3 }
  0xcf   :  { %v794_v54 = vpack.c.bf16 %v411_v52, %v408_v46  ;;  %v834_v55 = vpack.c.bf16 %v459_v53, %v456_v47  ;;  %v318_v56 = vpop.f32.mrf.mxu0  ;;  %v366_v57 = vpop.f32.mrf.mxu1 }
  0xd1   :  { %874 = vst [vmem:[#allocation2 + $0x98] sm:$0xff] %v794_v54  }
  0xd2   :  { %882 = vst [vmem:[#allocation2 + $0xd8] sm:$0xff] %v834_v55  }
  0xd6   :  { %v414_v58 = vpop.f32.mrf.mxu2  ;;  %v462_v59 = vpop.f32.mrf.mxu3 }
  0xd7   :  { %v321_v60 = vpop.f32.mrf.mxu0  ;;  %v369_v61 = vpop.f32.mrf.mxu1 }
  0xd8   :  { %v719_v62 = vpack.c.bf16 %v321_v60, %v318_v56  ;;  %v759_v63 = vpack.c.bf16 %v369_v61, %v366_v57 }
  0xda   :  { %859 = vst [vmem:[#allocation2 + $0x20] sm:$0xff] %v719_v62  }
  0xdb   :  { %867 = vst [vmem:[#allocation2 + $0x60] sm:$0xff] %v759_v63  }
  0xde   :  { %v417_v0 = vpop.f32.mrf.mxu2  ;;  %v465_v1 = vpop.f32.mrf.mxu3 }
  0xdf   :  { %v799_v2 = vpack.c.bf16 %v417_v0, %v414_v58  ;;  %v839_v3 = vpack.c.bf16 %v465_v1, %v462_v59  ;;  %v324_v4 = vpop.f32.mrf.mxu0  ;;  %v372_v5 = vpop.f32.mrf.mxu1 }
  0xe1   :  { %875 = vst [vmem:[#allocation2 + $0xa0] sm:$0xff] %v799_v2  }
  0xe2   :  { %883 = vst [vmem:[#allocation2 + $0xe0] sm:$0xff] %v839_v3  }
  0xe6   :  { %v420_v6 = vpop.f32.mrf.mxu2  ;;  %v468_v7 = vpop.f32.mrf.mxu3 }
  0xe7   :  { %v327_v8 = vpop.f32.mrf.mxu0  ;;  %v375_v9 = vpop.f32.mrf.mxu1 }
  0xe8   :  { %v724_v10 = vpack.c.bf16 %v327_v8, %v324_v4  ;;  %v764_v11 = vpack.c.bf16 %v375_v9, %v372_v5 }
  0xea   :  { %860 = vst [vmem:[#allocation2 + $0x28] sm:$0xff] %v724_v10  }
  0xeb   :  { %868 = vst [vmem:[#allocation2 + $0x68] sm:$0xff] %v764_v11  }
  0xee   :  { %v423_v12 = vpop.f32.mrf.mxu2  ;;  %v471_v13 = vpop.f32.mrf.mxu3 }
  0xef   :  { %v804_v14 = vpack.c.bf16 %v423_v12, %v420_v6  ;;  %v844_v15 = vpack.c.bf16 %v471_v13, %v468_v7  ;;  %v330_v16 = vpop.f32.mrf.mxu0  ;;  %v378_v17 = vpop.f32.mrf.mxu1 }
  0xf1   :  { %876 = vst [vmem:[#allocation2 + $0xa8] sm:$0xff] %v804_v14  }
  0xf2   :  { %884 = vst [vmem:[#allocation2 + $0xe8] sm:$0xff] %v844_v15  }
  0xf6   :  { %v426_v18 = vpop.f32.mrf.mxu2  ;;  %v474_v19 = vpop.f32.mrf.mxu3 }
  0xf7   :  { %v333_v20 = vpop.f32.mrf.mxu0  ;;  %v381_v21 = vpop.f32.mrf.mxu1 }
  0xf8   :  { %v729_v22 = vpack.c.bf16 %v333_v20, %v330_v16  ;;  %v769_v23 = vpack.c.bf16 %v381_v21, %v378_v17 }
  0xfa   :  { %861 = vst [vmem:[#allocation2 + $0x30] sm:$0xff] %v729_v22  }
  0xfb   :  { %869 = vst [vmem:[#allocation2 + $0x70] sm:$0xff] %v769_v23  }
  0xfe   :  { %v429_v24 = vpop.f32.mrf.mxu2  ;;  %v477_v25 = vpop.f32.mrf.mxu3 }
  0xff   :  { %v809_v26 = vpack.c.bf16 %v429_v24, %v426_v18  ;;  %v849_v27 = vpack.c.bf16 %v477_v25, %v474_v19  ;;  %v336_v28 = vpop.f32.mrf.mxu0  ;;  %v384_v29 = vpop.f32.mrf.mxu1 }
 0x101   :  { %877 = vst [vmem:[#allocation2 + $0xb0] sm:$0xff] %v809_v26  }
 0x102   :  { %885 = vst [vmem:[#allocation2 + $0xf0] sm:$0xff] %v849_v27  }
 0x106   :  { %v432_v30 = vpop.f32.mrf.mxu2  ;;  %v480_v31 = vpop.f32.mrf.mxu3 }
 0x107   :  { %v339_v32 = vpop.f32.mrf.mxu0  ;;  %v387_v33 = vpop.f32.mrf.mxu1 }
 0x108   :  { %v734_v34 = vpack.c.bf16 %v339_v32, %v336_v28  ;;  %v774_v35 = vpack.c.bf16 %v387_v33, %v384_v29 }
 0x10a   :  { %862 = vst [vmem:[#allocation2 + $0x38] sm:$0xff] %v734_v34  }
 0x10b   :  { %870 = vst [vmem:[#allocation2 + $0x78] sm:$0xff] %v774_v35  }
 0x10e   :  { %v435_v36 = vpop.f32.mrf.mxu2  ;;  %v483_v37 = vpop.f32.mrf.mxu3 }
 0x10f   :  { %v814_v38 = vpack.c.bf16 %v435_v36, %v432_v30  ;;  %v854_v39 = vpack.c.bf16 %v483_v37, %v480_v31 }
 0x111   :  { %878 = vst [vmem:[#allocation2 + $0xb8] sm:$0xff] %v814_v38  }
 0x112   :  { %886 = vst [vmem:[#allocation2 + $0xf8] sm:$0xff] %v854_v39  }
 0x113   :  { %626 = dma.vmem_to_hbm [thread:$0]  %s619_s8, 4096, %s621_s11, [#allocation3], %s941_s12, %s941_s12, %s942_s13  }
 0x114   :  { %938 = dma.done.wait [#allocation3], 4096  }
 0x115   :  { %939 = vsyncadd [#allocation3], 4294963200 }
 0x116   :  { %631 = vsyncpa [#allocation3], 1 }

</bundles_post_ra>
